<compile_context>
chip_gen: v5e
topology: v5e:2x2
jax: 0.10.0
libtpu: 0.0.40
codegen_flags: <defaults>
</compile_context>

<pallas_src>
import functools

import jax
import jax.numpy as jnp
from jax import lax
from jax.experimental import pallas as pl
from jax.experimental.pallas import tpu as pltpu


def _round_up(x, m):
    return (x + m - 1) // m * m


def _cdiv(a, b):
    return -(-a // b)


def _conv_stats_kernel(x_ref, w_ref, stats_ref, *, rows, tile, need_mask, compute_dtype):
    """Pass 1: zm = x_packed @ W_blockdiag; emit per-tile channel sum / sum-of-squares."""
    x = x_ref[...].astype(compute_dtype)
    zm = jnp.dot(x, w_ref[...], preferred_element_type=jnp.float32)   # (tile, W) f32
    if need_mask:
        # Ragged last tile: rows past `rows` hold unspecified data -> exclude from stats.
        n_valid = rows - pl.program_id(0) * tile
        row_ids = lax.broadcasted_iota(jnp.int32, zm.shape, 0)
        zm = jnp.where(row_ids < n_valid, zm, 0.0)
    stats_ref[0, 0:1, :] = jnp.sum(zm, axis=0, keepdims=True)          # partial sum
    stats_ref[0, 1:2, :] = jnp.sum(zm * zm, axis=0, keepdims=True)     # partial sum of squares


def _conv_bn_kernel(x_ref, w_ref, scale_ref, shift_ref, o_ref, *, compute_dtype):
    """Pass 2: recompute zm and apply batch norm as a per-channel affine transform."""
    x = x_ref[...].astype(compute_dtype)
    zm = jnp.dot(x, w_ref[...], preferred_element_type=jnp.float32)
    o_ref[...] = (zm * scale_ref[...] + shift_ref[...]).astype(o_ref.dtype)


@functools.partial(jax.jit, static_argnames=("tile_rows", "mxu_dtype"))
def embedder_forward(inputs, weight, bias, gamma, beta, eps=1e-5, *,
                     tile_rows=2048, mxu_dtype=jnp.bfloat16):
    """inputs: (B, N, d_input) -> (B, N, d_model). Matches PyTorch Embedder.forward (train mode)."""
    B, N, d_in = inputs.shape
    d_model = weight.shape[0]            # PyTorch Conv1d weight: (d_model, d_input, 1)
    M = B * N
    f32 = jnp.float32

    # Activations keep their native floating dtype (x is read twice from HBM).
    x_dtype = inputs.dtype if jnp.issubdtype(inputs.dtype, jnp.floating) else f32
    out_dtype = x_dtype

    # ---- lane-dense packing: `pack` positions per 128-lane vreg row --------------------
    if d_in >= 128:
        d_in_pad = _round_up(d_in, 128)
        pack = 1
    else:
        d_in_pad = 1 << (d_in - 1).bit_length()     # next power of two (divides 128)
        pack = 128 // d_in_pad
    Kp = pack * d_in_pad                  # packed contraction width (128 when d_in < 128)
    W = pack * d_model                    # packed output lane width

    # Pad only up to a whole number of 8 packed rows (<= 8*pack - 1 positions, usually 0
    # -> pure reshape, no extra HBM copy of the input before pass 1).
    M_pad = _round_up(M, 8 * pack)
    rows = M_pad // pack                  # packed rows, multiple of 8

    x2d = inputs.reshape(M, d_in).astype(x_dtype)
    pad_pos, pad_lane = M_pad - M, d_in_pad - d_in
    if pad_pos or pad_lane:
        x2d = jnp.pad(x2d, ((0, pad_pos), (0, pad_lane)))
    x_packed = x2d.reshape(rows, Kp)

    # Block-diagonal weight: `pack` copies of W^T on the diagonal -> (Kp, W).
    wt = jnp.transpose(weight.reshape(d_model, d_in)).astype(f32)      # (d_in, d_model)
    if pad_lane:
        wt = jnp.pad(wt, ((0, pad_lane), (0, 0)))
    w_big = jax.scipy.linalg.block_diag(*([wt] * pack)) if pack > 1 else wt
    w_big = w_big.astype(mxu_dtype)       # bf16 operands, f32 MXU accumulation

    # ---- row tiling ----------------------------------------------------------------------
    tile_rows = max(8, _round_up(int(tile_rows), 8))   # defensive: multiple of 8 sublanes
    tile = min(tile_rows, rows)
    if rows >= 256:
        # Keep >= 2 grid steps so the "parallel" axis can shard across both TensorCores
        # on megacore parts (v7x).
        tile = min(tile, _round_up(_cdiv(rows, 2), 8))
    n_tiles = _cdiv(rows, tile)
    need_mask = (rows % tile) != 0

    x_bytes = jnp.dtype(x_dtype).itemsize
    w_bytes = jnp.dtype(mxu_dtype).itemsize
    o_bytes = jnp.dtype(out_dtype).itemsize

    # ---- Pass 1: conv (matmul) + per-tile channel statistics ----------------------------
    stats = pl.pallas_call(
        functools.partial(_conv_stats_kernel, rows=rows, tile=tile,
                          need_mask=need_mask, compute_dtype=mxu_dtype),
        out_shape=jax.ShapeDtypeStruct((n_tiles, 2, W), f32),
        grid_spec=pltpu.PrefetchScalarGridSpec(
            num_scalar_prefetch=0,
            grid=(n_tiles,),
            in_specs=[
                pl.BlockSpec((tile, Kp), lambda i: (i, 0)),
                pl.BlockSpec((Kp, W), lambda i: (0, 0)),
            ],
            out_specs=pl.BlockSpec((1, 2, W), lambda i: (i, 0, 0)),
        ),
        compiler_params=pltpu.CompilerParams(dimension_semantics=("parallel",)),
        cost_estimate=pl.CostEstimate(
            flops=2 * rows * Kp * W,
            transcendentals=0,
            bytes_accessed=x_bytes * rows * Kp + w_bytes * Kp * W + 4 * n_tiles * 2 * W,
        ),
    )(x_packed, w_big)

    # ---- Cheap scalar glue: batch-norm scale / shift -------------------------------------
    # The Conv1d bias shifts z and mean(z) identically, so it cancels exactly in
    # training-mode batch norm and never appears below.
    s_c = jnp.sum(stats[:, 0, :], axis=0).reshape(pack, d_model).sum(axis=0)
    ss_c = jnp.sum(stats[:, 1, :], axis=0).reshape(pack, d_model).sum(axis=0)
    mean_zm = s_c / M                                          # mean of x @ W^T (pre-bias)
    var = jnp.maximum(ss_c / M - mean_zm * mean_zm, 0.0)       # biased variance (PyTorch BN fwd)
    # TODO(synk): switch to a per-tile Welford/Chan merge if B*N becomes large enough for
    #             E[z^2]-E[z]^2 in f32 to lose precision.
    inv_std = lax.rsqrt(var + eps)
    scale_c = gamma.astype(f32) * inv_std
    shift_c = beta.astype(f32) - scale_c * mean_zm

    scale_w = jnp.tile(scale_c, pack).reshape(1, W)
    shift_w = jnp.tile(shift_c, pack).reshape(1, W)

    # ---- Pass 2: recompute conv and apply batch norm -------------------------------------
    y_packed = pl.pallas_call(
        functools.partial(_conv_bn_kernel, compute_dtype=mxu_dtype),
        out_shape=jax.ShapeDtypeStruct((rows, W), out_dtype),
        grid_spec=pltpu.PrefetchScalarGridSpec(
            num_scalar_prefetch=0,
            grid=(n_tiles,),
            in_specs=[
                pl.BlockSpec((tile, Kp), lambda i: (i, 0)),
                pl.BlockSpec((Kp, W), lambda i: (0, 0)),
                pl.BlockSpec((1, W), lambda i: (0, 0)),
                pl.BlockSpec((1, W), lambda i: (0, 0)),
            ],
            out_specs=pl.BlockSpec((tile, W), lambda i: (i, 0)),
        ),
        compiler_params=pltpu.CompilerParams(dimension_semantics=("parallel",)),
        cost_estimate=pl.CostEstimate(
            flops=2 * rows * Kp * W + 2 * rows * W,
            transcendentals=0,
            bytes_accessed=(x_bytes * rows * Kp + w_bytes * Kp * W + 4 * 2 * W
                            + o_bytes * rows * W),
        ),
    )(x_packed, w_big, scale_w, shift_w)

    y = y_packed.reshape(M_pad, d_model)[:M]        # slice is a no-op when M % (8*pack) == 0
    return y.reshape(B, N, d_model)


def _reference_forward(inputs, weight, bias, gamma, beta, eps=1e-5):
    """Pure-JAX reference matching the PyTorch forward (training-mode BN)."""
    d_model, d_in = weight.shape[0], weight.shape[1]
    w2d = weight.reshape(d_model, d_in)
    z = jnp.einsum("bnd,cd->bnc", inputs, w2d) + bias            # (B, N, d_model)
    mean = jnp.mean(z, axis=(0, 1))
    var = jnp.mean((z - mean) ** 2, axis=(0, 1))                 # biased
    return (z - mean) * lax.rsqrt(var + eps) * gamma + beta


def _check(out, inputs, weight, bias, gamma, beta):
    # Reference 1: exact f32 semantics (loose tolerance: the MXU consumes bf16 operands).
    ref_f32 = _reference_forward(inputs, weight, bias, gamma, beta)
    # Reference 2: same math with inputs/weights pre-rounded to bf16 (what the MXU actually
    # sees) -> validates the kernel algebra tightly.
    ref_bf16 = _reference_forward(
        inputs.astype(jnp.bfloat16).astype(jnp.float32),
        weight.astype(jnp.bfloat16).astype(jnp.float32), bias, gamma, beta)
    err_tight = float(jnp.max(jnp.abs(out - ref_bf16)))
    err_loose = float(jnp.max(jnp.abs(out - ref_f32)))
    assert err_tight < 2e-3, f"mismatch vs bf16-input reference: {err_tight}"
    assert err_loose < 5e-2, f"mismatch vs f32 reference: {err_loose}"


if __name__ == "__main__":
    key = jax.random.PRNGKey(0)

    # --- Test 1: small shapes consistent with the module, fast path (no padding/masking) ---
    B, N, d_input, d_model = 2, 64, 16, 32
    k_x, k_w, k_b, k_g, k_be = jax.random.split(key, 5)
    inputs = jax.random.normal(k_x, (B, N, d_input), dtype=jnp.float32)
    weight = jax.random.normal(k_w, (d_model, d_input, 1), dtype=jnp.float32) * 0.1
    bias = jax.random.normal(k_b, (d_model,), dtype=jnp.float32) * 0.05
    gamma = 1.0 + 0.1 * jax.random.normal(k_g, (d_model,), dtype=jnp.float32)
    beta = 0.05 * jax.random.normal(k_be, (d_model,), dtype=jnp.float32)

    out = jax.block_until_ready(embedder_forward(inputs, weight, bias, gamma, beta))
    assert out.shape == (B, N, d_model)
    _check(out, inputs, weight, bias, gamma, beta)

    # --- Test 2: non-power-of-two d_input + ragged last tile (exercises lane padding and
    # --- the in-kernel statistics mask) ---
    B2, N2, d_input2, d_model2 = 2, 96, 12, 32
    k_x2, k_w2, k_b2, k_g2, k_be2 = jax.random.split(jax.random.PRNGKey(1), 5)
    inputs2 = jax.random.normal(k_x2, (B2, N2, d_input2), dtype=jnp.float32)
    weight2 = jax.random.normal(k_w2, (d_model2, d_input2, 1), dtype=jnp.float32) * 0.1
    bias2 = jax.random.normal(k_b2, (d_model2,), dtype=jnp.float32) * 0.05
    gamma2 = 1.0 + 0.1 * jax.random.normal(k_g2, (d_model2,), dtype=jnp.float32)
    beta2 = 0.05 * jax.random.normal(k_be2, (d_model2,), dtype=jnp.float32)

    out2 = jax.block_until_ready(
        embedder_forward(inputs2, weight2, bias2, gamma2, beta2, tile_rows=16))
    assert out2.shape == (B2, N2, d_model2)
    _check(out2, inputs2, weight2, bias2, gamma2, beta2)

    print("KERNEL_OK")
</pallas_src>

<mosaic_0001>
module attributes {stable_mosaic.version = 11 : i64} {
  func.func @_conv_stats_kernel(%arg0: i32, %arg1: memref<16x128xf32, #tpu.memory_space<vmem>>, %arg2: memref<128x256xbf16, #tpu.memory_space<vmem>>, %arg3: memref<1x2x256xf32, #tpu.memory_space<vmem>>) attributes {dimension_semantics = [#tpu.dimension_semantics<parallel>], iteration_bounds = array<i64: 1>, scalar_prefetch = 0 : i64, scratch_operands = 0 : i64, tpu.core_type = #tpu.core_type<tc>, window_params = [{transform_indices = @transform_0, window_bounds = array<i64: 16, 128>}, {pipeline_mode = #tpu.pipeline_mode<synchronous>, transform_indices = @transform_1, window_bounds = array<i64: 128, 256>}, {transform_indices = @transform_2, window_bounds = array<i64: 1, 2, 256>}]} {
    %c0 = arith.constant 0 : index
    %c0_0 = arith.constant 0 : index
    %0 = vector.load %arg1[%c0, %c0_0] : memref<16x128xf32, #tpu.memory_space<vmem>>, vector<16x128xf32>
    %1 = arith.truncf %0 : vector<16x128xf32> to vector<16x128xbf16>
    %c0_1 = arith.constant 0 : index
    %c0_2 = arith.constant 0 : index
    %2 = vector.load %arg2[%c0_1, %c0_2] : memref<128x256xbf16, #tpu.memory_space<vmem>>, vector<128x256xbf16>
    %cst = arith.constant dense<0.000000e+00> : vector<16x256xf32>
    %3 = tpu.matmul %1, %2, %cst {dimension_numbers = #tpu.dot_dimension_numbers<[1], [0], [0], [1], [0, 0, 1, 1], [], []>} : vector<16x128xbf16>, vector<128x256xbf16>, vector<16x256xf32> -> vector<16x256xf32>
    %cst_3 = arith.constant dense<0.000000e+00> : vector<256xf32>
    %4 = vector.multi_reduction <add>, %3, %cst_3 [0] : vector<16x256xf32> to vector<256xf32>
    %5 = vector.shape_cast %4 : vector<256xf32> to vector<1x256xf32>
    %c0_4 = arith.constant 0 : index
    %c0_5 = arith.constant 0 : index
    %c0_6 = arith.constant 0 : index
    %6 = vector.load %arg3[%c0_4, %c0_5, %c0_6] : memref<1x2x256xf32, #tpu.memory_space<vmem>>, vector<1x1x256xf32>
    %7 = vector.shape_cast %6 : vector<1x1x256xf32> to vector<1x256xf32>
    %8 = vector.shape_cast %5 : vector<1x256xf32> to vector<1x1x256xf32>
    tpu.vector_store %arg3[%c0_4, %c0_5, %c0_6], %8 {strides = array<i32>} : memref<1x2x256xf32, #tpu.memory_space<vmem>>, vector<1x1x256xf32>,
    %9 = arith.mulf %3, %3 : vector<16x256xf32>
    %cst_7 = arith.constant dense<0.000000e+00> : vector<256xf32>
    %10 = vector.multi_reduction <add>, %9, %cst_7 [0] : vector<16x256xf32> to vector<256xf32>
    %11 = vector.shape_cast %10 : vector<256xf32> to vector<1x256xf32>
    %c0_8 = arith.constant 0 : index
    %c1 = arith.constant 1 : index
    %c0_9 = arith.constant 0 : index
    %12 = vector.load %arg3[%c0_8, %c1, %c0_9] : memref<1x2x256xf32, #tpu.memory_space<vmem>>, vector<1x1x256xf32>
    %13 = vector.shape_cast %12 : vector<1x1x256xf32> to vector<1x256xf32>
    %14 = vector.shape_cast %11 : vector<1x256xf32> to vector<1x1x256xf32>
    tpu.vector_store %arg3[%c0_8, %c1, %c0_9], %14 {strides = array<i32>} : memref<1x2x256xf32, #tpu.memory_space<vmem>>, vector<1x1x256xf32>,
    return
  }
  func.func @transform_0(%arg0: i32) -> (i32, i32) {
    %c0_i32 = arith.constant 0 : i32
    %c0_i32_0 = arith.constant 0 : i32
    return %arg0, %c0_i32 : i32, i32
  }
  func.func @transform_1(%arg0: i32) -> (i32, i32) {
    %c0_i32 = arith.constant 0 : i32
    %c0_i32_0 = arith.constant 0 : i32
    %c0_i32_1 = arith.constant 0 : i32
    return %c0_i32, %c0_i32_0 : i32, i32
  }
  func.func @transform_2(%arg0: i32) -> (i32, i32, i32) {
    %c0_i32 = arith.constant 0 : i32
    %c0_i32_0 = arith.constant 0 : i32
    %c0_i32_1 = arith.constant 0 : i32
    return %arg0, %c0_i32, %c0_i32_0 : i32, i32, i32
  }
}

module attributes {stable_mosaic.version = 11 : i64} {
  func.func @_conv_bn_kernel(%arg0: i32, %arg1: memref<16x128xf32, #tpu.memory_space<vmem>>, %arg2: memref<128x256xbf16, #tpu.memory_space<vmem>>, %arg3: memref<1x256xf32, #tpu.memory_space<vmem>>, %arg4: memref<1x256xf32, #tpu.memory_space<vmem>>, %arg5: memref<16x256xf32, #tpu.memory_space<vmem>>) attributes {dimension_semantics = [#tpu.dimension_semantics<parallel>], iteration_bounds = array<i64: 1>, scalar_prefetch = 0 : i64, scratch_operands = 0 : i64, tpu.core_type = #tpu.core_type<tc>, window_params = [{transform_indices = @transform_0, window_bounds = array<i64: 16, 128>}, {pipeline_mode = #tpu.pipeline_mode<synchronous>, transform_indices = @transform_1, window_bounds = array<i64: 128, 256>}, {pipeline_mode = #tpu.pipeline_mode<synchronous>, transform_indices = @transform_2, window_bounds = array<i64: 1, 256>}, {pipeline_mode = #tpu.pipeline_mode<synchronous>, transform_indices = @transform_3, window_bounds = array<i64: 1, 256>}, {transform_indices = @transform_4, window_bounds = array<i64: 16, 256>}]} {
    %c0 = arith.constant 0 : index
    %c0_0 = arith.constant 0 : index
    %0 = vector.load %arg1[%c0, %c0_0] : memref<16x128xf32, #tpu.memory_space<vmem>>, vector<16x128xf32>
    %1 = arith.truncf %0 : vector<16x128xf32> to vector<16x128xbf16>
    %c0_1 = arith.constant 0 : index
    %c0_2 = arith.constant 0 : index
    %2 = vector.load %arg2[%c0_1, %c0_2] : memref<128x256xbf16, #tpu.memory_space<vmem>>, vector<128x256xbf16>
    %cst = arith.constant dense<0.000000e+00> : vector<16x256xf32>
    %3 = tpu.matmul %1, %2, %cst {dimension_numbers = #tpu.dot_dimension_numbers<[1], [0], [0], [1], [0, 0, 1, 1], [], []>} : vector<16x128xbf16>, vector<128x256xbf16>, vector<16x256xf32> -> vector<16x256xf32>
    %c0_3 = arith.constant 0 : index
    %c0_4 = arith.constant 0 : index
    %4 = vector.load %arg3[%c0_3, %c0_4] : memref<1x256xf32, #tpu.memory_space<vmem>>, vector<1x256xf32>
    %5 = vector.broadcast %4 : vector<1x256xf32> to vector<16x256xf32>
    %6 = arith.mulf %3, %5 : vector<16x256xf32>
    %c0_5 = arith.constant 0 : index
    %c0_6 = arith.constant 0 : index
    %7 = vector.load %arg4[%c0_5, %c0_6] : memref<1x256xf32, #tpu.memory_space<vmem>>, vector<1x256xf32>
    %8 = vector.broadcast %7 : vector<1x256xf32> to vector<16x256xf32>
    %9 = arith.addf %6, %8 : vector<16x256xf32>
    %c0_7 = arith.constant 0 : index
    %c0_8 = arith.constant 0 : index
    %10 = vector.load %arg5[%c0_7, %c0_8] : memref<16x256xf32, #tpu.memory_space<vmem>>, vector<16x256xf32>
    tpu.vector_store %arg5[%c0_7, %c0_8], %9 {strides = array<i32>} : memref<16x256xf32, #tpu.memory_space<vmem>>, vector<16x256xf32>,
    return
  }
  func.func @transform_0(%arg0: i32) -> (i32, i32) {
    %c0_i32 = arith.constant 0 : i32
    %c0_i32_0 = arith.constant 0 : i32
    return %arg0, %c0_i32 : i32, i32
  }
  func.func @transform_1(%arg0: i32) -> (i32, i32) {
    %c0_i32 = arith.constant 0 : i32
    %c0_i32_0 = arith.constant 0 : i32
    %c0_i32_1 = arith.constant 0 : i32
    return %c0_i32, %c0_i32_0 : i32, i32
  }
  func.func @transform_2(%arg0: i32) -> (i32, i32) {
    %c0_i32 = arith.constant 0 : i32
    %c0_i32_0 = arith.constant 0 : i32
    %c0_i32_1 = arith.constant 0 : i32
    return %c0_i32, %c0_i32_0 : i32, i32
  }
  func.func @transform_3(%arg0: i32) -> (i32, i32) {
    %c0_i32 = arith.constant 0 : i32
    %c0_i32_0 = arith.constant 0 : i32
    %c0_i32_1 = arith.constant 0 : i32
    return %c0_i32, %c0_i32_0 : i32, i32
  }
  func.func @transform_4(%arg0: i32) -> (i32, i32) {
    %c0_i32 = arith.constant 0 : i32
    %c0_i32_0 = arith.constant 0 : i32
    return %arg0, %c0_i32 : i32, i32
  }
}

</mosaic_0001>

<bundles_post_ra>
// kernel: tile.18
= control target key start
LH: loop header
LB: loop body
LE: loop exit
PB: predicated region body
PF: predicated region fallthrough
CT: control target
= control target key end

     0   :  { %s22_s0 = inlined_call_operand.vmem [shape: f32[32], index: 0, kind: input, shape index: {}]   ;;  %s23_s1 = inlined_call_operand.vmem [shape: f32[8,32], index: 1, kind: output, shape index: {}]  }
   0x1   :  { %v4_v0 = vld [vmem:[%s22_s0] ss:$0 sm:$0xff] }
   0x2   :  { %5 = vst [vmem:[%s23_s1] sm:$0xff] %v4_v0 }

// kernel: tile.19
= control target key start
LH: loop header
LB: loop body
LE: loop exit
PB: predicated region body
PF: predicated region fallthrough
CT: control target
= control target key end

     0   :  { %s7_s6 = smov 3  ;;  %s46_s9 = smov 96   ;;  %vm4_vm0 = vcmask 261120   ;;  %vm11_vm1 = vcmask 1048320   ;;  %vm18_vm2 = vcmask 785920   ;;  %vm25_vm3 = vcmask 523520   ;;  %s77_s0 = inlined_call_operand.vmem [shape: f32[8,32], index: 0, kind: input, shape index: {}]   ;;  %s78_s1 = inlined_call_operand.vmem [shape: f32[1,256], index: 1, kind: output, shape index: {}]  }
   0x1   :  { %v39_v0 = vld [vmem:[%s77_s0 + $0x3] ss:$4 sm:%s7_s6]   ;;  %s21_s10 = smov 3  ;;  %s14_s13 = smov 3 }
   0x2   :  { %9 = vrot.lane.b32.xlu0 %v39_v0, %s46_s9  ;;  %v41_v1 = vld [vmem:[%s77_s0 + $0x1] ss:$4 sm:%s21_s10]   ;;  %s47_s14 = smov 32   ;;  %s48_s17 = smov 64  }
   0x3   :  { %23 = vrot.lane.b32.xlu1 %v41_v1, %s47_s14  ;;  %v40_v2 = vld [vmem:[%s77_s0 + $0x2] ss:$4 sm:%s14_s13]   ;;  %s2_s18 = smov 3 }
   0x4   :  { %v3_v3 = vld [vmem:[%s77_s0] ss:$4 sm:%s2_s18]  }
   0x5   :  { %5 = vst.msk [vmem:[#allocation0] ss:$8 sm:$0x3] %vm4_vm0, %v3_v3  }
   0xa   :  { %16 = vrot.lane.b32.xlu0 %v40_v2, %s48_s17 }
  0x74   :  { %v10_v4 = vpop.permute.xlu0 %9  }
  0x75   :  { %12 = vst.msk [vmem:[#allocation0] ss:$8 sm:$0x3] %vm11_vm1, %v10_v4   ;;  %v24_v5 = vpop.permute.xlu1 %23  }
  0x7c   :  { %v17_v6 = vpop.permute.xlu0 %16  }
  0x7d   :  { %19 = vst.msk [vmem:[#allocation0] ss:$8 sm:$0x3] %vm18_vm2, %v17_v6  }
  0x7e   :  { %26 = vst.msk [vmem:[#allocation0] ss:$8 sm:$0x3] %vm25_vm3, %v24_v5  }
  0x85   :  { %v29_v7 = vld [vmem:[#allocation0] sm:$0x1]  ;;  %v34_v8 = vld [vmem:[#allocation0 + $0x8] sm:$0x1] }
  0x86   :  { %32 = vst [vmem:[%s78_s1] sm:$0x1] %v29_v7 }
  0x87   :  { %42 = vst [vmem:[%s78_s1 + $0x1] sm:$0x1] %v34_v8 }

// kernel: embedder_forward.2
= control target key start
LH: loop header
LB: loop body
LE: loop exit
PB: predicated region body
PF: predicated region fallthrough
CT: control target
= control target key end

     0   :  { %vm155_vm0 = vcmask 1040384   ;;  %s396_s1 = inlined_call_operand.vmem [shape: bf16[128,256], index: 1, kind: input, shape index: {}]   ;;  %s397_s0 = inlined_call_operand.vmem [shape: f32[16,128], index: 0, kind: input, shape index: {}]   ;;  %s398_s2 = inlined_call_operand.vmem [shape: f32[1,2,256], index: 2, kind: output, shape index: {}]  }
   0x1   :  { %v250_v0 = vld [vmem:[%s396_s1 + $0x70] sm:$0xf]  ;;  %v272_v1 = vld [vmem:[%s396_s1 + $0x74] sm:$0xf0]  ;;  %v271_v2 = vld [vmem:[%s396_s1 + $0x74] sm:$0xf] }
   0x2   :  { %v251_v3 = vor.u32 %v272_v1, %v250_v0  ;;  %v252_v4 = vld [vmem:[%s396_s1 + $0x78] sm:$0xf0]  ;;  %v242_v5 = vld [vmem:[%s396_s1 + $0x60] sm:$0xf]  ;;  %v270_v6 = vld [vmem:[%s396_s1 + $0x64] sm:$0xf0] }
   0x3   :  { %v255_v7 = vor.u32 %v271_v2, %v252_v4  ;;  %v269_v8 = vld [vmem:[%s396_s1 + $0x64] sm:$0xf]  ;;  %v244_v9 = vld [vmem:[%s396_s1 + $0x68] sm:$0xf0]  ;;  %v243_v10 = vor.u32 %v270_v6, %v242_v5  ;;  %v234_v12 = vld [vmem:[%s396_s1 + $0x50] sm:$0xf] }
   0x4   :  { %110 = vmatpush.bf16.msra.mxu0 %v251_v3  ;;  %v247_v11 = vor.u32 %v269_v8, %v244_v9  ;;  %v268_v13 = vld [vmem:[%s396_s1 + $0x54] sm:$0xf0]  ;;  %v267_v14 = vld [vmem:[%s396_s1 + $0x54] sm:$0xf]  ;;  %v236_v15 = vld [vmem:[%s396_s1 + $0x58] sm:$0xf0] }
   0x5   :  { %124 = vmatpush.bf16.msra.mxu1 %v255_v7  ;;  %v235_v16 = vor.u32 %v268_v13, %v234_v12  ;;  %v239_v17 = vor.u32 %v267_v14, %v236_v15  ;;  %v226_v18 = vld [vmem:[%s396_s1 + $0x40] sm:$0xf]  ;;  %v266_v19 = vld [vmem:[%s396_s1 + $0x44] sm:$0xf0]  ;;  %v265_v20 = vld [vmem:[%s396_s1 + $0x44] sm:$0xf] }
   0x6   :  { %v228_v21 = vld [vmem:[%s396_s1 + $0x48] sm:$0xf0]  ;;  %v227_v22 = vor.u32 %v266_v19, %v226_v18  ;;  %v218_v24 = vld [vmem:[%s396_s1 + $0x30] sm:$0xf]  ;;  %v264_v25 = vld [vmem:[%s396_s1 + $0x34] sm:$0xf0] }
   0x7   :  { %v231_v23 = vor.u32 %v265_v20, %v228_v21  ;;  %v263_v26 = vld [vmem:[%s396_s1 + $0x34] sm:$0xf]  ;;  %v220_v27 = vld [vmem:[%s396_s1 + $0x38] sm:$0xf0]  ;;  %v219_v28 = vor.u32 %v264_v25, %v218_v24  ;;  %v210_v30 = vld [vmem:[%s396_s1 + $0x20] sm:$0xf] }
   0x8   :  { %111 = vmatpush.bf16.msra.mxu0 %v243_v10  ;;  %v223_v29 = vor.u32 %v263_v26, %v220_v27  ;;  %v262_v31 = vld [vmem:[%s396_s1 + $0x24] sm:$0xf0]  ;;  %v261_v32 = vld [vmem:[%s396_s1 + $0x24] sm:$0xf]  ;;  %v212_v33 = vld [vmem:[%s396_s1 + $0x28] sm:$0xf0] }
   0x9   :  { %125 = vmatpush.bf16.msra.mxu1 %v247_v11  ;;  %v211_v34 = vor.u32 %v262_v31, %v210_v30  ;;  %v215_v35 = vor.u32 %v261_v32, %v212_v33  ;;  %v202_v36 = vld [vmem:[%s396_s1 + $0x10] sm:$0xf]  ;;  %v260_v37 = vld [vmem:[%s396_s1 + $0x14] sm:$0xf0]  ;;  %v259_v38 = vld [vmem:[%s396_s1 + $0x14] sm:$0xf] }
   0xa   :  { %v204_v39 = vld [vmem:[%s396_s1 + $0x18] sm:$0xf0]  ;;  %v203_v40 = vor.u32 %v260_v37, %v202_v36  ;;  %v194_v42 = vld [vmem:[%s396_s1] sm:$0xf]  ;;  %v258_v43 = vld [vmem:[%s396_s1 + $0x4] sm:$0xf0] }
   0xb   :  { %v207_v41 = vor.u32 %v259_v38, %v204_v39  ;;  %v257_v44 = vld [vmem:[%s396_s1 + $0x4] sm:$0xf]  ;;  %v196_v45 = vld [vmem:[%s396_s1 + $0x8] sm:$0xf0]  ;;  %v195_v46 = vor.u32 %v258_v43, %v194_v42 }
   0xc   :  { %112 = vmatpush.bf16.msra.mxu0 %v235_v16  ;;  %v11_v47 = vld [vmem:[%s397_s0] sm:$0xff]  ;;  %v12_v48 = vld [vmem:[%s397_s0 + $0x8] sm:$0xff]  ;;  %v199_v49 = vor.u32 %v257_v44, %v196_v45  ;;  %v158_v16 = vlaneseq }
   0xd   :  { %126 = vmatpush.bf16.msra.mxu1 %v239_v17  ;;  %v13_v50 = vpack.c.bf16 %v12_v48, %v11_v47 }
   0xe   :  { %vm160_vm1 = vcmp.lt.s32.totalorder %v158_v16, 256 }
  0x10   :  { %113 = vmatpush.bf16.msra.mxu0 %v227_v22 }
  0x11   :  { %127 = vmatpush.bf16.msra.mxu1 %v231_v23 }
  0x14   :  { %114 = vmatpush.bf16.msra.mxu0 %v219_v28 }
  0x15   :  { %128 = vmatpush.bf16.msra.mxu1 %v223_v29 }
  0x18   :  { %115 = vmatpush.bf16.msra.mxu0 %v211_v34 }
  0x19   :  { %129 = vmatpush.bf16.msra.mxu1 %v215_v35 }
  0x1c   :  { %116 = vmatpush.bf16.msra.mxu0 %v203_v40 }
  0x1d   :  { %130 = vmatpush.bf16.msra.mxu1 %v207_v41 }
  0x20   :  { %117 = vmatpush.bf16.msra.mxu0 %v195_v46 }
  0x21   :  { %131 = vmatpush.bf16.msra.mxu1 %v199_v49 }
  0x23   :  { %118 = vmatmul.bf16.vlgmr.msra.gmra.mxu0 %v13_v50 }
  0x24   :  { %132 = vmatmul.bf16.vlgmr.msra.gmra.mxu1 %v13_v50 }
  0xa0   :  { %v119_v51 = vpop.f32.mrf.mxu0 }
  0xa1   :  { %v133_v52 = vpop.f32.mrf.mxu1  ;;  %v163_v54 = vmul.f32 %v119_v51, %v119_v51 }
  0xa2   :  { %v164_v58 = vmul.f32 %v133_v52, %v133_v52 }
  0xa8   :  { %v121_v53 = vpop.f32.mrf.mxu0 }
  0xa9   :  { %v138_v55 = vadd.f32 %v121_v53, %v119_v51  ;;  %v165_v56 = vmul.f32 %v121_v53, %v121_v53  ;;  %v135_v57 = vpop.f32.mrf.mxu1 }
  0xaa   :  { %v145_v59 = vadd.f32 %v135_v57, %v133_v52  ;;  %v166_v60 = vmul.f32 %v135_v57, %v135_v57 }
  0xab   :  { %v139_v61 = vrot.slane %v138_v55, 4  ;;  %v167_v62 = vadd.f32 %v165_v56, %v163_v54 }
  0xac   :  { %v146_v63 = vrot.slane %v145_v59, 4  ;;  %v174_v0 = vadd.f32 %v166_v60, %v164_v58 }
  0xad   :  { %v140_v1 = vadd.f32 %v139_v61, %v138_v55  ;;  %v168_v2 = vrot.slane %v167_v62, 4 }
  0xae   :  { %v147_v3 = vadd.f32 %v146_v63, %v145_v59  ;;  %v175_v4 = vrot.slane %v174_v0, 4 }
  0xaf   :  { %v141_v5 = vrot.slane %v140_v1, 2  ;;  %v169_v6 = vadd.f32 %v168_v2, %v167_v62 }
  0xb0   :  { %v148_v7 = vrot.slane %v147_v3, 2  ;;  %v176_v8 = vadd.f32 %v175_v4, %v174_v0 }
  0xb1   :  { %v142_v9 = vadd.f32 %v141_v5, %v140_v1  ;;  %v170_v10 = vrot.slane %v169_v6, 2 }
  0xb2   :  { %v149_v11 = vadd.f32 %v148_v7, %v147_v3  ;;  %v177_v12 = vrot.slane %v176_v8, 2 }
  0xb3   :  { %v171_v13 = vadd.f32 %v170_v10, %v169_v6  ;;  %v143_v14 = vrot.slane %v142_v9, 1 }
  0xb4   :  { %v150_v15 = vrot.slane %v149_v11, 1  ;;  %v178_v17 = vadd.f32 %v177_v12, %v176_v8 }
  0xb5   :  { %v172_v18 = vrot.slane %v171_v13, 1  ;;  %v144_v21 = vadd.f32 %v143_v14, %v142_v9 }
  0xb6   :  { %v151_v19 = vadd.f32 %v150_v15, %v149_v11  ;;  %v179_v20 = vrot.slane %v178_v17, 1 }
  0xb7   :  { %v173_v24 = vadd.f32 %v172_v18, %v171_v13 }
  0xb8   :  { %v154_v22 = vrot.slane %v151_v19, 7  ;;  %v180_v23 = vadd.f32 %v179_v20, %v178_v17 }
  0xba   :  { %v156_v25 = vsel %vm155_vm0, %v144_v21, %v154_v22  ;;  %v183_v26 = vrot.slane %v180_v23, 7 }
  0xbb   :  { %162 = vst.msk [vmem:[%s398_s2] ss:$2 sm:$0x3] %vm160_vm1, %v156_v25 }
  0xbc   :  { %v184_v27 = vsel %vm155_vm0, %v173_v24, %v183_v26 }
  0xbd   :  { %256 = vst.msk [vmem:[%s398_s2 + $0x1] ss:$2 sm:$0x3] %vm160_vm1, %v184_v27 }

// kernel: embedder_forward.3
= control target key start
LH: loop header
LB: loop body
LE: loop exit
PB: predicated region body
PF: predicated region fallthrough
CT: control target
= control target key end

     0   :  { %s397_s1 = inlined_call_operand.vmem [shape: bf16[128,256], index: 1, kind: input, shape index: {}]   ;;  %s398_s0 = inlined_call_operand.vmem [shape: f32[16,128], index: 0, kind: input, shape index: {}]   ;;  %s399_s2 = inlined_call_operand.vmem [shape: f32[1,256], index: 2, kind: input, shape index: {}]   ;;  %s400_s3 = inlined_call_operand.vmem [shape: f32[1,256], index: 3, kind: input, shape index: {}]   ;;  %s401_s4 = inlined_call_operand.vmem [shape: f32[16,256], index: 4, kind: output, shape index: {}]  }
   0x1   :  { %v230_v0 = vld [vmem:[%s397_s1 + $0x70] sm:$0xf]  ;;  %v251_v1 = vld [vmem:[%s397_s1 + $0x74] sm:$0xf0]  ;;  %v250_v2 = vld [vmem:[%s397_s1 + $0x74] sm:$0xf] }
   0x2   :  { %v231_v3 = vor.u32 %v251_v1, %v230_v0  ;;  %v232_v4 = vld [vmem:[%s397_s1 + $0x78] sm:$0xf0]  ;;  %v222_v5 = vld [vmem:[%s397_s1 + $0x60] sm:$0xf]  ;;  %v249_v6 = vld [vmem:[%s397_s1 + $0x64] sm:$0xf0] }
   0x3   :  { %v235_v7 = vor.u32 %v250_v2, %v232_v4  ;;  %v248_v8 = vld [vmem:[%s397_s1 + $0x64] sm:$0xf]  ;;  %v224_v9 = vld [vmem:[%s397_s1 + $0x68] sm:$0xf0]  ;;  %v223_v10 = vor.u32 %v249_v6, %v222_v5  ;;  %v214_v12 = vld [vmem:[%s397_s1 + $0x50] sm:$0xf] }
   0x4   :  { %116 = vmatpush.bf16.msra.mxu0 %v231_v3  ;;  %v227_v11 = vor.u32 %v248_v8, %v224_v9  ;;  %v247_v13 = vld [vmem:[%s397_s1 + $0x54] sm:$0xf0]  ;;  %v246_v14 = vld [vmem:[%s397_s1 + $0x54] sm:$0xf]  ;;  %v216_v15 = vld [vmem:[%s397_s1 + $0x58] sm:$0xf0] }
   0x5   :  { %130 = vmatpush.bf16.msra.mxu1 %v235_v7  ;;  %v215_v16 = vor.u32 %v247_v13, %v214_v12  ;;  %v219_v17 = vor.u32 %v246_v14, %v216_v15  ;;  %v206_v18 = vld [vmem:[%s397_s1 + $0x40] sm:$0xf]  ;;  %v245_v19 = vld [vmem:[%s397_s1 + $0x44] sm:$0xf0]  ;;  %v244_v20 = vld [vmem:[%s397_s1 + $0x44] sm:$0xf] }
   0x6   :  { %v208_v21 = vld [vmem:[%s397_s1 + $0x48] sm:$0xf0]  ;;  %v207_v22 = vor.u32 %v245_v19, %v206_v18  ;;  %v198_v24 = vld [vmem:[%s397_s1 + $0x30] sm:$0xf]  ;;  %v243_v25 = vld [vmem:[%s397_s1 + $0x34] sm:$0xf0] }
   0x7   :  { %v211_v23 = vor.u32 %v244_v20, %v208_v21  ;;  %v242_v26 = vld [vmem:[%s397_s1 + $0x34] sm:$0xf]  ;;  %v200_v27 = vld [vmem:[%s397_s1 + $0x38] sm:$0xf0]  ;;  %v199_v28 = vor.u32 %v243_v25, %v198_v24  ;;  %v190_v30 = vld [vmem:[%s397_s1 + $0x20] sm:$0xf] }
   0x8   :  { %117 = vmatpush.bf16.msra.mxu0 %v223_v10  ;;  %v203_v29 = vor.u32 %v242_v26, %v200_v27  ;;  %v241_v31 = vld [vmem:[%s397_s1 + $0x24] sm:$0xf0]  ;;  %v240_v32 = vld [vmem:[%s397_s1 + $0x24] sm:$0xf]  ;;  %v192_v33 = vld [vmem:[%s397_s1 + $0x28] sm:$0xf0] }
   0x9   :  { %131 = vmatpush.bf16.msra.mxu1 %v227_v11  ;;  %v191_v34 = vor.u32 %v241_v31, %v190_v30  ;;  %v195_v35 = vor.u32 %v240_v32, %v192_v33  ;;  %v182_v36 = vld [vmem:[%s397_s1 + $0x10] sm:$0xf]  ;;  %v239_v37 = vld [vmem:[%s397_s1 + $0x14] sm:$0xf0]  ;;  %v238_v38 = vld [vmem:[%s397_s1 + $0x14] sm:$0xf] }
   0xa   :  { %v184_v39 = vld [vmem:[%s397_s1 + $0x18] sm:$0xf0]  ;;  %v183_v40 = vor.u32 %v239_v37, %v182_v36  ;;  %v174_v42 = vld [vmem:[%s397_s1] sm:$0xf]  ;;  %v237_v43 = vld [vmem:[%s397_s1 + $0x4] sm:$0xf0] }
   0xb   :  { %v187_v41 = vor.u32 %v238_v38, %v184_v39  ;;  %v236_v44 = vld [vmem:[%s397_s1 + $0x4] sm:$0xf]  ;;  %v176_v45 = vld [vmem:[%s397_s1 + $0x8] sm:$0xf0]  ;;  %v175_v46 = vor.u32 %v237_v43, %v174_v42  ;;  %v144_v51 = vld [vmem:[%s399_s2] sm:$0x3] }
   0xc   :  { %118 = vmatpush.bf16.msra.mxu0 %v215_v16  ;;  %v17_v47 = vld [vmem:[%s398_s0] sm:$0xff]  ;;  %v18_v48 = vld [vmem:[%s398_s0 + $0x8] sm:$0xff]  ;;  %v179_v49 = vor.u32 %v236_v44, %v176_v45  ;;  %v146_v53 = vperm.slane %v144_v51, 0  ;;  %v147_v54 = vperm.slane %v144_v51, 1 }
   0xd   :  { %132 = vmatpush.bf16.msra.mxu1 %v219_v17  ;;  %v19_v50 = vpack.c.bf16 %v18_v48, %v17_v47  ;;  %v154_v52 = vld [vmem:[%s400_s3] sm:$0x3] }
   0xe   :  { %v156_v55 = vperm.slane %v154_v52, 0  ;;  %v157_v57 = vperm.slane %v154_v52, 1 }
  0x10   :  { %119 = vmatpush.bf16.msra.mxu0 %v207_v22 }
  0x11   :  { %133 = vmatpush.bf16.msra.mxu1 %v211_v23 }
  0x14   :  { %120 = vmatpush.bf16.msra.mxu0 %v199_v28 }
  0x15   :  { %134 = vmatpush.bf16.msra.mxu1 %v203_v29 }
  0x18   :  { %121 = vmatpush.bf16.msra.mxu0 %v191_v34 }
  0x19   :  { %135 = vmatpush.bf16.msra.mxu1 %v195_v35 }
  0x1c   :  { %122 = vmatpush.bf16.msra.mxu0 %v183_v40 }
  0x1d   :  { %136 = vmatpush.bf16.msra.mxu1 %v187_v41 }
  0x20   :  { %123 = vmatpush.bf16.msra.mxu0 %v175_v46 }
  0x21   :  { %137 = vmatpush.bf16.msra.mxu1 %v179_v49 }
  0x23   :  { %124 = vmatmul.bf16.vlgmr.msra.gmra.mxu0 %v19_v50 }
  0x24   :  { %138 = vmatmul.bf16.vlgmr.msra.gmra.mxu1 %v19_v50 }
  0xa0   :  { %v125_v56 = vpop.f32.mrf.mxu0 }
  0xa1   :  { %v150_v58 = vmul.f32 %v146_v53, %v125_v56  ;;  %v139_v59 = vpop.f32.mrf.mxu1 }
  0xa2   :  { %v151_v60 = vmul.f32 %v147_v54, %v139_v59 }
  0xa3   :  { %v160_v61 = vadd.f32 %v156_v55, %v150_v58 }
  0xa4   :  { %v161_v62 = vadd.f32 %v157_v57, %v151_v60 }
  0xa5   :  { %164 = vst [vmem:[%s401_s4] sm:$0xff] %v160_v61 }
  0xa6   :  { %165 = vst [vmem:[%s401_s4 + $0x8] sm:$0xff] %v161_v62 }
  0xa8   :  { %v127_v63 = vpop.f32.mrf.mxu0 }
  0xa9   :  { %v152_v0 = vmul.f32 %v146_v53, %v127_v63  ;;  %v141_v1 = vpop.f32.mrf.mxu1 }
  0xaa   :  { %v153_v2 = vmul.f32 %v147_v54, %v141_v1 }
  0xab   :  { %v162_v3 = vadd.f32 %v156_v55, %v152_v0 }
  0xac   :  { %v163_v4 = vadd.f32 %v157_v57, %v153_v2 }
  0xad   :  { %166 = vst [vmem:[%s401_s4 + $0x10] sm:$0xff] %v162_v3 }
  0xae   :  { %167 = vst [vmem:[%s401_s4 + $0x18] sm:$0xff] %v163_v4 }

</bundles_post_ra>
